<compile_context>
chip_gen: v7x
topology: tpu7x:2x2x1
jax: 0.10.0
libtpu: 0.0.40
codegen_flags: <defaults>
</compile_context>

<pallas_src>
import functools

import jax
import jax.numpy as jnp
from jax.experimental import pallas as pl
from jax.experimental.pallas import tpu as pltpu

_N_PAD = 8      # class axis padded to 8 (block last dim == array last dim -> legal spec)
_N_CLS = 2
_NLL_COL = 2    # padded column that carries the per-row NLL in the loss kernel


# ---------------------------------------------------------------------------
# Kernels
# ---------------------------------------------------------------------------
def _mlp_logits_kernel(x_ref, w1_ref, b1_ref, w2_ref, b2_ref, out_ref):
    """out = tanh(x @ W1 + b1) @ W2_pad + b2_pad  ->  (tb, 8) f32."""
    xb = x_ref[...].astype(jnp.bfloat16)           # VPU cast, hidden under MXU/DMA slack
    h = jnp.tanh(
        jnp.dot(xb, w1_ref[...], preferred_element_type=jnp.float32) + b1_ref[...]
    )
    logits = (
        jnp.dot(h.astype(jnp.bfloat16), w2_ref[...],
                preferred_element_type=jnp.float32)
        + b2_ref[...]
    )
    out_ref[...] = logits.astype(out_ref.dtype)


def _mlp_logits_loss_kernel(x_ref, labels_ref, w1_ref, b1_ref, w2_ref, b2_ref, out_ref):
    """Same as above, plus the per-row cross-entropy NLL packed into column 2."""
    xb = x_ref[...].astype(jnp.bfloat16)
    h = jnp.tanh(
        jnp.dot(xb, w1_ref[...], preferred_element_type=jnp.float32) + b1_ref[...]
    )
    logits = (
        jnp.dot(h.astype(jnp.bfloat16), w2_ref[...],
                preferred_element_type=jnp.float32)
        + b2_ref[...]
    )

    # Exact 2-class cross entropy: nll = softplus(logit_other - logit_label).
    # Only two (tb, 1) transcendental slices; no wide-lane max/sum/exp.
    l0 = logits[:, 0:1]
    l1 = logits[:, 1:2]
    labels = labels_ref[...]                        # (tb, 1) int32
    # TODO(synk): torch CrossEntropyLoss raises on labels outside {0, 1}; here
    # any label != 1 is silently treated as class 0.
    diff = jnp.where(labels == 1, l0 - l1, l1 - l0)
    m = jnp.maximum(diff, 0.0)
    nll = m + jnp.log(jnp.exp(diff - m) + jnp.exp(-m))   # stable softplus(diff)

    # Pack nll into padded column _NLL_COL -> one output slab, no extra store.
    col = jax.lax.broadcasted_iota(jnp.int32, logits.shape, dimension=1)
    packed = jnp.where(col == _NLL_COL, jnp.broadcast_to(nll, logits.shape), logits)
    out_ref[...] = packed.astype(out_ref.dtype)


# ---------------------------------------------------------------------------
# Wrapper ("AuditModel.forward")
# ---------------------------------------------------------------------------
def _batch_tile(batch, d_in, hidden):
    """Rows per grid step.  Large enough to amortize the ~0.35us per-step
    overhead, small enough that the double-buffered x / output blocks stay
    inside an ~8 MiB per-buffer budget (safe on v7x's 64 MiB physical VMEM)."""
    per_row = 6 * d_in + 6 * hidden + 4 * _N_PAD + 16   # f32+bf16 x, f32+bf16 h, out, labels
    tb = min(2048, max(16, (8 << 20) // max(per_row, 1)))
    tb -= tb % 16
    if batch <= tb:
        if batch >= 32:
            # Split into two tiles so the "parallel" batch axis can be sharded
            # across both TensorCores on v7x.
            half = -(-batch // 2)
            tb = -(-half // 16) * 16
        else:
            tb = max(8, -(-batch // 8) * 8)
    return tb


@functools.partial(jax.jit, static_argnames=("with_labels",))
def audit_model_forward(params, x, labels=None, *, with_labels=False):
    """Replicates AuditModel.forward.

    params: dict with w1 (D_in,H), b1 (1,H), w2 (H,2), b2 (1,2) (pre-transposed)
    x:      (B, D_in) float32
    labels: (B,) int32 class ids (optional)
    Returns logits (B, 2), or (logits, loss) when with_labels=True.
    """
    B, d_in = x.shape
    hidden = params["w1"].shape[1]

    # bf16 MXU operands (f32 accumulation in-kernel).  The 2-class head is
    # zero-padded to 8 lane columns; padded columns are never used by the loss
    # (exact 2-class form) and are sliced off / overwritten for the logits.
    w1 = params["w1"].astype(jnp.bfloat16)
    b1 = params["b1"].astype(jnp.float32).reshape(1, hidden)
    w2 = params["w2"].astype(jnp.float32)
    b2 = params["b2"].astype(jnp.float32).reshape(1, -1)
    n_cls = w2.shape[1]
    w2p = jnp.zeros((hidden, _N_PAD), jnp.bfloat16).at[:, :n_cls].set(
        w2.astype(jnp.bfloat16))
    b2p = jnp.zeros((1, _N_PAD), jnp.float32).at[:, :n_cls].set(b2)

    tb = _batch_tile(B, d_in, hidden)
    grid = (pl.cdiv(B, tb),)

    x_spec = pl.BlockSpec((tb, d_in), lambda i: (i, 0))
    # NOTE(v7x): with large d_in*hidden weights, add pipeline_mode=pl.Buffered(1)
    # to the constant-index weight specs below so the VMEM-resident weights are
    # single-buffered (reclaims their second buffer at zero perf cost).
    w1_spec = pl.BlockSpec((d_in, hidden), lambda i: (0, 0))
    b1_spec = pl.BlockSpec((1, hidden), lambda i: (0, 0))
    w2_spec = pl.BlockSpec((hidden, _N_PAD), lambda i: (0, 0))
    b2_spec = pl.BlockSpec((1, _N_PAD), lambda i: (0, 0))
    out_spec = pl.BlockSpec((tb, _N_PAD), lambda i: (i, 0))

    cparams = pltpu.CompilerParams(
        dimension_semantics=("parallel",),
        vmem_limit_bytes=32 * 1024 * 1024,
    )
    flops = 2 * B * d_in * hidden + 2 * B * hidden * _N_PAD
    bytes_accessed = (
        B * d_in * 4                 # x (f32, cast in-kernel)
        + d_in * hidden * 2          # w1 (bf16)
        + hidden * 4                 # b1
        + hidden * _N_PAD * 2        # padded w2 (bf16)
        + _N_PAD * 4                 # padded b2
        + B * _N_PAD * 4             # logits(+nll) writeback
    )

    if not with_labels:
        out = pl.pallas_call(
            _mlp_logits_kernel,
            out_shape=jax.ShapeDtypeStruct((B, _N_PAD), jnp.float32),
            grid=grid,
            in_specs=[x_spec, w1_spec, b1_spec, w2_spec, b2_spec],
            out_specs=out_spec,
            compiler_params=cparams,
            cost_estimate=pl.CostEstimate(
                flops=flops, transcendentals=B * hidden,
                bytes_accessed=bytes_accessed),
        )(x, w1, b1, w2p, b2p)
        return out[:, :n_cls]

    labels2d = labels.astype(jnp.int32).reshape(B, 1)
    labels_spec = pl.BlockSpec((tb, 1), lambda i: (i, 0))
    out = pl.pallas_call(
        _mlp_logits_loss_kernel,
        out_shape=jax.ShapeDtypeStruct((B, _N_PAD), jnp.float32),
        grid=grid,
        in_specs=[x_spec, labels_spec, w1_spec, b1_spec, w2_spec, b2_spec],
        out_specs=out_spec,
        compiler_params=cparams,
        cost_estimate=pl.CostEstimate(
            flops=flops, transcendentals=B * hidden + 3 * B,
            bytes_accessed=bytes_accessed + B * 4),
    )(x, labels2d, w1, b1, w2p, b2p)

    logits = out[:, :n_cls]
    # Rows of a partial last tile are never written back (blocked out_spec
    # discards out-of-range rows), so summing the first B rows is exact.
    loss = jnp.sum(out[:, _NLL_COL]) / jnp.float32(B)
    return logits, loss


# ---------------------------------------------------------------------------
# Predict ("AuditModel.predict") — forward + softmax + decision in one jit
# ---------------------------------------------------------------------------
@jax.jit
def _predict_device(params, x):
    logits = audit_model_forward(params, x)
    pred = jax.nn.softmax(logits, axis=-1)
    ans = (pred[:, 1] >= pred[:, 0]).astype(jnp.int32)   # torch: ans=0 iff p0 > p1
    return ans, pred


def audit_model_predict(params, x):
    ans, pred = jax.device_get(_predict_device(params, x))
    return ans.tolist(), pred


# ---------------------------------------------------------------------------
# Deterministic parameter init (matches nn.Linear shapes/semantics)
# ---------------------------------------------------------------------------
def init_params(input_size, hidden_states, num_classes=2):
    key = jax.random.PRNGKey(0)
    k1, k2, k3, k4 = jax.random.split(key, 4)
    lim1 = 1.0 / jnp.sqrt(jnp.float32(input_size))
    lim2 = 1.0 / jnp.sqrt(jnp.float32(hidden_states))
    # Stored pre-transposed: (in, out) so kernel does x @ W + b (== x @ W_torch^T + b)
    w1 = jax.random.uniform(k1, (input_size, hidden_states), jnp.float32, -lim1, lim1)
    b1 = jax.random.uniform(k2, (1, hidden_states), jnp.float32, -lim1, lim1)
    w2 = jax.random.uniform(k3, (hidden_states, num_classes), jnp.float32, -lim2, lim2)
    b2 = jax.random.uniform(k4, (1, num_classes), jnp.float32, -lim2, lim2)
    return {"w1": w1, "b1": b1, "w2": w2, "b2": b2}


# ---------------------------------------------------------------------------
# Pure-JAX reference (mirrors the kernel's bf16 MXU-operand numerics)
# ---------------------------------------------------------------------------
def _ref_forward(params, x, labels=None):
    # TODO(synk): the PyTorch AuditModel is pure f32; bf16 MXU operands with f32
    # accumulation deviate by <~1e-3 relative at these shapes.
    h = jnp.tanh(
        jnp.dot(x.astype(jnp.bfloat16), params["w1"].astype(jnp.bfloat16),
                preferred_element_type=jnp.float32)
        + params["b1"].reshape(1, -1)
    )
    logits = (
        jnp.dot(h.astype(jnp.bfloat16), params["w2"].astype(jnp.bfloat16),
                preferred_element_type=jnp.float32)
        + params["b2"].reshape(1, -1)
    )
    if labels is None:
        return logits
    logp = jax.nn.log_softmax(logits, axis=-1)
    loss = -jnp.mean(jnp.take_along_axis(logp, labels[:, None], axis=-1))
    return logits, loss


if __name__ == "__main__":
    INPUT_SIZE, HIDDEN, BATCH = 32, 32, 8
    params = init_params(INPUT_SIZE, HIDDEN)

    key = jax.random.PRNGKey(0)
    kx, kl = jax.random.split(key)
    x = jax.random.normal(kx, (BATCH, INPUT_SIZE), jnp.float32)
    labels = jax.random.randint(kl, (BATCH,), 0, 2, jnp.int32)

    # Forward without labels (logits only)
    logits = jax.block_until_ready(audit_model_forward(params, x))

    # Forward with labels (logits, cross-entropy loss)
    logits_l, loss = audit_model_forward(params, x, labels, with_labels=True)
    jax.block_until_ready((logits_l, loss))

    ref_logits, ref_loss = _ref_forward(params, x, labels)
    assert logits.shape == (BATCH, 2)
    assert jnp.allclose(logits, ref_logits, atol=5e-3, rtol=5e-3)
    assert jnp.allclose(logits_l, ref_logits, atol=5e-3, rtol=5e-3)
    assert jnp.allclose(loss, ref_loss, atol=5e-3, rtol=5e-3)

    # Larger, non-tile-aligned batch exercises the 2-step grid + partial tile
    # (rows past B are read but never written back / never enter the loss sum).
    B2 = 1037
    kx2, kl2 = jax.random.split(jax.random.PRNGKey(1))
    x2 = jax.random.normal(kx2, (B2, INPUT_SIZE), jnp.float32)
    labels2 = jax.random.randint(kl2, (B2,), 0, 2, jnp.int32)
    logits2, loss2 = audit_model_forward(params, x2, labels2, with_labels=True)
    jax.block_until_ready((logits2, loss2))
    ref_logits2, ref_loss2 = _ref_forward(params, x2, labels2)
    assert jnp.allclose(logits2, ref_logits2, atol=5e-3, rtol=5e-3)
    assert jnp.allclose(loss2, ref_loss2, atol=5e-3, rtol=5e-3)

    # Predict path (forward + softmax + decision fused on device, one transfer)
    ans, pred = audit_model_predict(params, x)
    assert len(ans) == BATCH and pred.shape == (BATCH, 2)

    print("KERNEL_OK")
</pallas_src>

<mosaic_0001>
module attributes {stable_mosaic.version = 11 : i64} {
  func.func @_mlp_logits_kernel(%arg0: i32, %arg1: memref<8x32xf32, #tpu.memory_space<vmem>>, %arg2: memref<32x32xbf16, #tpu.memory_space<vmem>>, %arg3: memref<1x32xf32, #tpu.memory_space<vmem>>, %arg4: memref<32x8xbf16, #tpu.memory_space<vmem>>, %arg5: memref<1x8xf32, #tpu.memory_space<vmem>>, %arg6: memref<8x8xf32, #tpu.memory_space<vmem>>) attributes {dimension_semantics = [#tpu.dimension_semantics<parallel>], iteration_bounds = array<i64: 1>, scalar_prefetch = 0 : i64, scratch_operands = 0 : i64, tpu.core_type = #tpu.core_type<tc>, window_params = [{transform_indices = @transform_0, window_bounds = array<i64: 8, 32>}, {pipeline_mode = #tpu.pipeline_mode<synchronous>, transform_indices = @transform_1, window_bounds = array<i64: 32, 32>}, {pipeline_mode = #tpu.pipeline_mode<synchronous>, transform_indices = @transform_2, window_bounds = array<i64: 1, 32>}, {pipeline_mode = #tpu.pipeline_mode<synchronous>, transform_indices = @transform_3, window_bounds = array<i64: 32, 8>}, {pipeline_mode = #tpu.pipeline_mode<synchronous>, transform_indices = @transform_4, window_bounds = array<i64: 1, 8>}, {transform_indices = @transform_5, window_bounds = array<i64: 8, 8>}]} {
    %c0 = arith.constant 0 : index
    %c0_0 = arith.constant 0 : index
    %0 = vector.load %arg1[%c0, %c0_0] : memref<8x32xf32, #tpu.memory_space<vmem>>, vector<8x32xf32>
    %1 = arith.truncf %0 : vector<8x32xf32> to vector<8x32xbf16>
    %c0_1 = arith.constant 0 : index
    %c0_2 = arith.constant 0 : index
    %2 = vector.load %arg2[%c0_1, %c0_2] : memref<32x32xbf16, #tpu.memory_space<vmem>>, vector<32x32xbf16>
    %cst = arith.constant dense<0.000000e+00> : vector<8x32xf32>
    %3 = tpu.matmul %1, %2, %cst {dimension_numbers = #tpu.dot_dimension_numbers<[1], [0], [0], [1], [0, 0, 1, 1], [], []>} : vector<8x32xbf16>, vector<32x32xbf16>, vector<8x32xf32> -> vector<8x32xf32>
    %c0_3 = arith.constant 0 : index
    %c0_4 = arith.constant 0 : index
    %4 = vector.load %arg3[%c0_3, %c0_4] : memref<1x32xf32, #tpu.memory_space<vmem>>, vector<1x32xf32>
    %5 = vector.broadcast %4 : vector<1x32xf32> to vector<8x32xf32>
    %6 = arith.addf %3, %5 : vector<8x32xf32>
    %7 = math.tanh %6 : vector<8x32xf32>
    %8 = arith.truncf %7 : vector<8x32xf32> to vector<8x32xbf16>
    %c0_5 = arith.constant 0 : index
    %c0_6 = arith.constant 0 : index
    %9 = vector.load %arg4[%c0_5, %c0_6] : memref<32x8xbf16, #tpu.memory_space<vmem>>, vector<32x8xbf16>
    %cst_7 = arith.constant dense<0.000000e+00> : vector<8x8xf32>
    %10 = tpu.matmul %8, %9, %cst_7 {dimension_numbers = #tpu.dot_dimension_numbers<[1], [0], [0], [1], [0, 0, 1, 1], [], []>} : vector<8x32xbf16>, vector<32x8xbf16>, vector<8x8xf32> -> vector<8x8xf32>
    %c0_8 = arith.constant 0 : index
    %c0_9 = arith.constant 0 : index
    %11 = vector.load %arg5[%c0_8, %c0_9] : memref<1x8xf32, #tpu.memory_space<vmem>>, vector<1x8xf32>
    %12 = vector.broadcast %11 : vector<1x8xf32> to vector<8x8xf32>
    %13 = arith.addf %10, %12 : vector<8x8xf32>
    %c0_10 = arith.constant 0 : index
    %c0_11 = arith.constant 0 : index
    %14 = vector.load %arg6[%c0_10, %c0_11] : memref<8x8xf32, #tpu.memory_space<vmem>>, vector<8x8xf32>
    tpu.vector_store %arg6[%c0_10, %c0_11], %13 {strides = array<i32>} : memref<8x8xf32, #tpu.memory_space<vmem>>, vector<8x8xf32>,
    return
  }
  func.func @transform_0(%arg0: i32) -> (i32, i32) {
    %c0_i32 = arith.constant 0 : i32
    %c0_i32_0 = arith.constant 0 : i32
    return %arg0, %c0_i32 : i32, i32
  }
  func.func @transform_1(%arg0: i32) -> (i32, i32) {
    %c0_i32 = arith.constant 0 : i32
    %c0_i32_0 = arith.constant 0 : i32
    %c0_i32_1 = arith.constant 0 : i32
    return %c0_i32, %c0_i32_0 : i32, i32
  }
  func.func @transform_2(%arg0: i32) -> (i32, i32) {
    %c0_i32 = arith.constant 0 : i32
    %c0_i32_0 = arith.constant 0 : i32
    %c0_i32_1 = arith.constant 0 : i32
    return %c0_i32, %c0_i32_0 : i32, i32
  }
  func.func @transform_3(%arg0: i32) -> (i32, i32) {
    %c0_i32 = arith.constant 0 : i32
    %c0_i32_0 = arith.constant 0 : i32
    %c0_i32_1 = arith.constant 0 : i32
    return %c0_i32, %c0_i32_0 : i32, i32
  }
  func.func @transform_4(%arg0: i32) -> (i32, i32) {
    %c0_i32 = arith.constant 0 : i32
    %c0_i32_0 = arith.constant 0 : i32
    %c0_i32_1 = arith.constant 0 : i32
    return %c0_i32, %c0_i32_0 : i32, i32
  }
  func.func @transform_5(%arg0: i32) -> (i32, i32) {
    %c0_i32 = arith.constant 0 : i32
    %c0_i32_0 = arith.constant 0 : i32
    return %arg0, %c0_i32 : i32, i32
  }
}

</mosaic_0001>

<bundles_post_ra>
// kernel: audit_model_forward.1
= control target key start
LH: loop header
LB: loop body
LE: loop exit
PB: predicated region body
PF: predicated region fallthrough
CT: control target
= control target key end

     0   :  { %v202_v0 = vmov 0.0   ;;  %vm203_vm0 = vmmov 0   ;;  %vm46_vm1 = vcmask 261120   ;;  %vm158_vm2 = vcmask 64512   ;;  %s260_s1 = inlined_call_operand.vmem [shape: bf16[32,32], index: 1, kind: input, shape index: {}]   ;;  %s261_s0 = inlined_call_operand.vmem [shape: f32[8,32], index: 0, kind: input, shape index: {}]   ;;  %s262_s3 = inlined_call_operand.vmem [shape: bf16[32,8], index: 3, kind: input, shape index: {}]   ;;  %s263_s2 = inlined_call_operand.vmem [shape: f32[1,32], index: 2, kind: input, shape index: {}]   ;;  %s264_s4 = inlined_call_operand.vmem [shape: f32[1,8], index: 4, kind: input, shape index: {}]   ;;  %s265_s5 = inlined_call_operand.vmem [shape: f32[8,8], index: 5, kind: output, shape index: {}]  }
   0x1   :  { %178 = vmatprep.subr.bf16.mxu0 %v202_v0  ;;  %v196_v1 = vld [vmem:[%s260_s1] sm:$0xff]   ;;  %182 = vmatprep.mubr.msk.bf16.mxu0 %vm203_vm0, %v202_v0  ;;  %v197_v2 = vld [vmem:[%s260_s1 + $0x8] sm:$0xff]  }
   0x2   :  { %186 = vmatprep.subr.bf16.mxu1 %v202_v0  ;;  %190 = vmatprep.mubr.msk.bf16.mxu1 %vm203_vm0, %v202_v0  ;;  %v21_v3 = vld [vmem:[%s261_s0] sm:$0xff]  ;;  %v199_v6 = vld [vmem:[%s262_s3 + $0x8] sm:$0xff]  }
   0x3   :  { %179 = vmatpush3.bf16.msra.mxu0 %v196_v1  ;;  %v22_v4 = vpack.c.bf16 %v21_v3, %v21_v3  ;;  %v198_v5 = vld [vmem:[%s262_s3] sm:$0xff]  }
   0x4   :  { %180 = vmatprep.subr.bf16.mxu0 %v202_v0  ;;  %187 = vmatpush3.bf16.msra.mxu1 %v198_v5  ;;  %v164_v7 = vld [vmem:[%s263_s2] ss:$0 sm:$0xff] }
   0x5   :  { %188 = vmatprep.subr.bf16.mxu1 %v202_v0  ;;  %v168_v15 = vld [vmem:[%s264_s4] ss:$0 sm:$0xff] }
   0x7   :  { %181 = vmatpush3.bf16.msra.mxu0 %v197_v2 }
   0x8   :  { %189 = vmatpush3.bf16.msra.mxu1 %v199_v6 }
   0xa   :  { %183 = vmatmul.mubr.msk.bf16.vlgmr.msra.gmra.mrb[0].mxu0 %vm46_vm1, %v22_v4 }
  0xdd   :  { %v84_v8 = vpop.f32.mrb[0].mxu0 }
  0xde   :  { %v85_v9 = vadd.f32 %v164_v7, %v84_v8  ;;  %v184_v10 = vpop.f32.mrb[1].mxu0 }
  0xdf   :  { %v87_v11 = vpop.f32.mrb[2].mxu0 }
  0xe0   :  { %200 = vtanh.f32 %v85_v9  ;;  %v185_v12 = vpop.f32.mrb[3].mxu0 }
  0xea   :  { %v201_v13 = vpop.eup %200 }
  0xeb   :  { %v91_v14 = vpack.c.bf16 %v201_v13, %v201_v13 }
  0xed   :  { %191 = vmatmul.mubr.msk.bf16.vlgmr.msra.gmra.mrb[0].mxu1 %vm46_vm1, %v91_v14 }
 0x1c0   :  { %v152_v16 = vpop.f32.mrb[0].mxu1 }
 0x1c1   :  { %v153_v17 = vadd.f32 %v168_v15, %v152_v16  ;;  %v192_v18 = vpop.f32.mrb[1].mxu1 }
 0x1c2   :  { %v155_v19 = vpop.f32.mrb[2].mxu1 }
 0x1c3   :  { %159 = vst.msk [vmem:[%s265_s5] sm:$0xff] %vm158_vm2, %v153_v17  ;;  %v193_v20 = vpop.f32.mrb[3].mxu1 }

</bundles_post_ra>
